<compile_context>
chip_gen: v5e
topology: v5e:2x2
jax: 0.10.0
libtpu: 0.0.40
codegen_flags: <defaults>
</compile_context>

<pallas_src>
from functools import partial

import jax
import jax.numpy as jnp
from jax.experimental import pallas as pl
from jax.experimental.pallas import tpu as pltpu

LANES = 128      # TPU vreg lane width
SUBLANES = 16    # bf16 sublane packing (also covers f32's requirement of 8)


def _round_up(x, m):
    return (x + m - 1) // m * m


def dqn_kernel(x_ref, w1_ref, w2_ref, w3_ref, bias_ref, o_ref):
    """Fused fc1+ReLU -> fc2+ReLU -> output on one (tb, d_in) batch tile.

    x arrives in f32 at its true feature width and is cast to the MXU compute
    dtype in-register. Matmuls accumulate in f32; bias-add / ReLU run in f32 on
    the VPU; the final store is bf16 to halve output HBM traffic.
    """
    bias = bias_ref[...]                                   # (8, LANES) f32, rows 0..2 used
    x = x_ref[...].astype(w1_ref.dtype)

    h1 = jnp.dot(x, w1_ref[...], preferred_element_type=jnp.float32)
    h1 = jnp.maximum(h1 + bias[0:1, : w1_ref.shape[1]], 0.0).astype(w2_ref.dtype)

    h2 = jnp.dot(h1, w2_ref[...], preferred_element_type=jnp.float32)
    h2 = jnp.maximum(h2 + bias[1:2, : w2_ref.shape[1]], 0.0).astype(w3_ref.dtype)

    out = jnp.dot(h2, w3_ref[...], preferred_element_type=jnp.float32)
    o_ref[...] = (out + bias[2:3, : w3_ref.shape[1]]).astype(o_ref.dtype)


def _pad2d(a, rows, cols, dtype):
    out = jnp.zeros((rows, cols), dtype)
    return out.at[: a.shape[0], : a.shape[1]].set(a.astype(dtype))


def prepare_params(params, compute_dtype=jnp.bfloat16):
    """Pad hidden/output feature dims to 128 lanes, cast weights to the MXU
    compute dtype, and pack the three biases into a single (8, 128) f32 tile.
    Call once; reuse across forward calls. w1 keeps its TRUE input width, so x
    never needs lane padding."""
    w1, b1, w2, b2, w3, b3 = params
    d_h1 = _round_up(w1.shape[1], LANES)
    d_h2 = _round_up(w2.shape[1], LANES)
    d_out = _round_up(w3.shape[1], LANES)
    lmax = max(d_h1, d_h2, d_out)

    w1p = _pad2d(w1, w1.shape[0], d_h1, compute_dtype)     # (64, 128)  bf16
    w2p = _pad2d(w2, d_h1, d_h2, compute_dtype)            # (128, 128) bf16
    w3p = _pad2d(w3, d_h2, d_out, compute_dtype)           # (128, 128) bf16

    bias = jnp.zeros((8, lmax), jnp.float32)               # one VMEM tile for all biases
    bias = bias.at[0, : b1.shape[-1]].set(b1.reshape(-1).astype(jnp.float32))
    bias = bias.at[1, : b2.shape[-1]].set(b2.reshape(-1).astype(jnp.float32))
    bias = bias.at[2, : b3.shape[-1]].set(b3.reshape(-1).astype(jnp.float32))

    return (w1p, w2p, w3p, bias), int(w3.shape[1])


@partial(jax.jit, static_argnames=("tile_b",))
def dqn_forward(x, padded_params, *, tile_b=1024):
    """Fused DQN forward. Returns the lane-padded (B, 128) bf16 Q-value tile;
    slice [:, :n_out] at the consumer so no extra output-sized HBM pass runs
    inside this function."""
    w1, w2, w3, bias = padded_params
    B, d_in = x.shape
    assert d_in == w1.shape[0], "x feature width must match fc1 input width"
    d_out = w3.shape[1]

    # Batch tiling: multiples of 16 sublanes, sized to minimize padding waste,
    # and >= 2 grid steps when possible so v7x shards the batch over both
    # TensorCores (one extra ~0.35us grid step is noise on single-TC v5e/v6e).
    tile_b = max(SUBLANES, _round_up(tile_b, SUBLANES))
    if B >= 2 * SUBLANES:
        nblk = max(2, pl.cdiv(B, tile_b))
        tb = _round_up(pl.cdiv(B, nblk), SUBLANES)
    else:
        tb = B                      # block equal to the full batch dim is always legal
    grid = pl.cdiv(B, tb)           # last block may be partial; rows are independent

    resident = lambda shape: pl.BlockSpec(shape, lambda i: (0, 0))

    return pl.pallas_call(
        dqn_kernel,
        out_shape=jax.ShapeDtypeStruct((B, d_out), jnp.bfloat16),
        grid=(grid,),
        in_specs=[
            pl.BlockSpec((tb, d_in), lambda i: (i, 0)),   # activations: streamed over batch
            resident(w1.shape),                            # weights + packed biases: DMA'd
            resident(w2.shape),                            # once, VMEM-resident across grid
            resident(w3.shape),
            resident(bias.shape),
        ],
        out_specs=pl.BlockSpec((tb, d_out), lambda i: (i, 0)),
        compiler_params=pltpu.CompilerParams(
            dimension_semantics=("parallel",),             # v7x: shard batch over 2 TCs
        ),
    )(x, w1, w2, w3, bias)


def init_linear(key, in_features, out_features, dtype=jnp.float32):
    # PyTorch nn.Linear default init: U(-1/sqrt(in), 1/sqrt(in)).
    kw, kb = jax.random.split(key)
    bound = 1.0 / jnp.sqrt(in_features)
    # weight stored already transposed: (in, out) so each layer is x @ W + b.
    w = jax.random.uniform(kw, (in_features, out_features), dtype, -bound, bound)
    b = jax.random.uniform(kb, (1, out_features), dtype, -bound, bound)
    return w, b


def dqn_reference(x, params):
    w1, b1, w2, b2, w3, b3 = params
    h1 = jnp.maximum(x @ w1 + b1, 0.0)
    h2 = jnp.maximum(h1 @ w2 + b2, 0.0)
    return h2 @ w3 + b3


if __name__ == "__main__":
    # DQN(l1=(64, 128), l2=(128, 32)) -> 4 Q-values
    l1 = (64, 128)
    l2 = (128, 32)
    batch = 8

    key = jax.random.PRNGKey(0)
    kx, k1, k2, k3 = jax.random.split(key, 4)

    x = jax.random.normal(kx, (batch, l1[0]), jnp.float32)
    w1, b1 = init_linear(k1, l1[0], l1[1])
    w2, b2 = init_linear(k2, l2[0], l2[1])
    w3, b3 = init_linear(k3, l2[1], 4)
    params = (w1, b1, w2, b2, w3, b3)

    # Pad/cast weights ONCE; reuse the single jitted forward for every call.
    padded_params, n_out = prepare_params(params, compute_dtype=jnp.bfloat16)

    out_padded = dqn_forward(x, padded_params)
    jax.block_until_ready(out_padded)

    # Slice the real Q-values at the consumer (kernel output stays lane-dense).
    out = out_padded[:, :n_out].astype(jnp.float32)

    ref = dqn_reference(x, params)
    assert out.shape == (batch, 4), out.shape
    err = float(jnp.max(jnp.abs(out - ref)))
    # bf16 matmul inputs + bf16 output store vs. pure-f32 reference.
    assert err < 7.5e-2, f"max abs err {err}"

    print("KERNEL_OK")
</pallas_src>

<mosaic_0001>
module attributes {stable_mosaic.version = 11 : i64} {
  func.func @dqn_kernel(%arg0: i32, %arg1: memref<8x64xf32, #tpu.memory_space<vmem>>, %arg2: memref<64x128xbf16, #tpu.memory_space<vmem>>, %arg3: memref<128x128xbf16, #tpu.memory_space<vmem>>, %arg4: memref<128x128xbf16, #tpu.memory_space<vmem>>, %arg5: memref<8x128xf32, #tpu.memory_space<vmem>>, %arg6: memref<8x128xbf16, #tpu.memory_space<vmem>>) attributes {dimension_semantics = [#tpu.dimension_semantics<parallel>], iteration_bounds = array<i64: 1>, scalar_prefetch = 0 : i64, scratch_operands = 0 : i64, tpu.core_type = #tpu.core_type<tc>, window_params = [{transform_indices = @transform_0, window_bounds = array<i64: 8, 64>}, {pipeline_mode = #tpu.pipeline_mode<synchronous>, transform_indices = @transform_1, window_bounds = array<i64: 64, 128>}, {pipeline_mode = #tpu.pipeline_mode<synchronous>, transform_indices = @transform_2, window_bounds = array<i64: 128, 128>}, {pipeline_mode = #tpu.pipeline_mode<synchronous>, transform_indices = @transform_3, window_bounds = array<i64: 128, 128>}, {pipeline_mode = #tpu.pipeline_mode<synchronous>, transform_indices = @transform_4, window_bounds = array<i64: 8, 128>}, {transform_indices = @transform_5, window_bounds = array<i64: 8, 128>}]} {
    %c0 = arith.constant 0 : index
    %c0_0 = arith.constant 0 : index
    %0 = vector.load %arg5[%c0, %c0_0] : memref<8x128xf32, #tpu.memory_space<vmem>>, vector<8x128xf32>
    %c0_1 = arith.constant 0 : index
    %c0_2 = arith.constant 0 : index
    %1 = vector.load %arg1[%c0_1, %c0_2] : memref<8x64xf32, #tpu.memory_space<vmem>>, vector<8x64xf32>
    %2 = arith.truncf %1 : vector<8x64xf32> to vector<8x64xbf16>
    %c0_3 = arith.constant 0 : index
    %c0_4 = arith.constant 0 : index
    %3 = vector.load %arg2[%c0_3, %c0_4] : memref<64x128xbf16, #tpu.memory_space<vmem>>, vector<64x128xbf16>
    %cst = arith.constant dense<0.000000e+00> : vector<8x128xf32>
    %4 = tpu.matmul %2, %3, %cst {dimension_numbers = #tpu.dot_dimension_numbers<[1], [0], [0], [1], [0, 0, 1, 1], [], []>} : vector<8x64xbf16>, vector<64x128xbf16>, vector<8x128xf32> -> vector<8x128xf32>
    %5 = vector.extract_strided_slice %0 {offsets = [0, 0], sizes = [1, 128], strides = [1, 1]} : vector<8x128xf32> to vector<1x128xf32>
    %6 = vector.broadcast %5 : vector<1x128xf32> to vector<8x128xf32>
    %7 = arith.addf %4, %6 : vector<8x128xf32>
    %cst_5 = arith.constant 0.000000e+00 : f32
    %8 = vector.broadcast %cst_5 : f32 to vector<8x128xf32>
    %9 = arith.maximumf %7, %8 : vector<8x128xf32>
    %10 = arith.truncf %9 : vector<8x128xf32> to vector<8x128xbf16>
    %c0_6 = arith.constant 0 : index
    %c0_7 = arith.constant 0 : index
    %11 = vector.load %arg3[%c0_6, %c0_7] : memref<128x128xbf16, #tpu.memory_space<vmem>>, vector<128x128xbf16>
    %cst_8 = arith.constant dense<0.000000e+00> : vector<8x128xf32>
    %12 = tpu.matmul %10, %11, %cst_8 {dimension_numbers = #tpu.dot_dimension_numbers<[1], [0], [0], [1], [0, 0, 1, 1], [], []>} : vector<8x128xbf16>, vector<128x128xbf16>, vector<8x128xf32> -> vector<8x128xf32>
    %13 = vector.extract_strided_slice %0 {offsets = [1, 0], sizes = [1, 128], strides = [1, 1]} : vector<8x128xf32> to vector<1x128xf32>
    %14 = vector.broadcast %13 : vector<1x128xf32> to vector<8x128xf32>
    %15 = arith.addf %12, %14 : vector<8x128xf32>
    %cst_9 = arith.constant 0.000000e+00 : f32
    %16 = vector.broadcast %cst_9 : f32 to vector<8x128xf32>
    %17 = arith.maximumf %15, %16 : vector<8x128xf32>
    %18 = arith.truncf %17 : vector<8x128xf32> to vector<8x128xbf16>
    %c0_10 = arith.constant 0 : index
    %c0_11 = arith.constant 0 : index
    %19 = vector.load %arg4[%c0_10, %c0_11] : memref<128x128xbf16, #tpu.memory_space<vmem>>, vector<128x128xbf16>
    %cst_12 = arith.constant dense<0.000000e+00> : vector<8x128xf32>
    %20 = tpu.matmul %18, %19, %cst_12 {dimension_numbers = #tpu.dot_dimension_numbers<[1], [0], [0], [1], [0, 0, 1, 1], [], []>} : vector<8x128xbf16>, vector<128x128xbf16>, vector<8x128xf32> -> vector<8x128xf32>
    %21 = vector.extract_strided_slice %0 {offsets = [2, 0], sizes = [1, 128], strides = [1, 1]} : vector<8x128xf32> to vector<1x128xf32>
    %22 = vector.broadcast %21 : vector<1x128xf32> to vector<8x128xf32>
    %23 = arith.addf %20, %22 : vector<8x128xf32>
    %24 = arith.truncf %23 : vector<8x128xf32> to vector<8x128xbf16>
    %c0_13 = arith.constant 0 : index
    %c0_14 = arith.constant 0 : index
    %25 = vector.load %arg6[%c0_13, %c0_14] : memref<8x128xbf16, #tpu.memory_space<vmem>>, vector<8x128xbf16>
    tpu.vector_store %arg6[%c0_13, %c0_14], %24 {strides = array<i32>} : memref<8x128xbf16, #tpu.memory_space<vmem>>, vector<8x128xbf16>,
    return
  }
  func.func @transform_0(%arg0: i32) -> (i32, i32) {
    %c0_i32 = arith.constant 0 : i32
    %c0_i32_0 = arith.constant 0 : i32
    return %arg0, %c0_i32 : i32, i32
  }
  func.func @transform_1(%arg0: i32) -> (i32, i32) {
    %c0_i32 = arith.constant 0 : i32
    %c0_i32_0 = arith.constant 0 : i32
    %c0_i32_1 = arith.constant 0 : i32
    return %c0_i32, %c0_i32_0 : i32, i32
  }
  func.func @transform_2(%arg0: i32) -> (i32, i32) {
    %c0_i32 = arith.constant 0 : i32
    %c0_i32_0 = arith.constant 0 : i32
    %c0_i32_1 = arith.constant 0 : i32
    return %c0_i32, %c0_i32_0 : i32, i32
  }
  func.func @transform_3(%arg0: i32) -> (i32, i32) {
    %c0_i32 = arith.constant 0 : i32
    %c0_i32_0 = arith.constant 0 : i32
    %c0_i32_1 = arith.constant 0 : i32
    return %c0_i32, %c0_i32_0 : i32, i32
  }
  func.func @transform_4(%arg0: i32) -> (i32, i32) {
    %c0_i32 = arith.constant 0 : i32
    %c0_i32_0 = arith.constant 0 : i32
    %c0_i32_1 = arith.constant 0 : i32
    return %c0_i32, %c0_i32_0 : i32, i32
  }
  func.func @transform_5(%arg0: i32) -> (i32, i32) {
    %c0_i32 = arith.constant 0 : i32
    %c0_i32_0 = arith.constant 0 : i32
    return %arg0, %c0_i32 : i32, i32
  }
}

</mosaic_0001>

<bundles_post_ra>
// kernel: dqn_forward.1
= control target key start
LH: loop header
LB: loop body
LE: loop exit
PB: predicated region body
PF: predicated region fallthrough
CT: control target
= control target key end

     0   :  { %10 = vsyncpa [#allocation3], 0  ;;  %s647_s0 = inlined_call_operand.hbm [shape: f32[8,64], index: 0, kind: input, shape index: {}]   ;;  %s648_s1 = inlined_call_operand.hbm [shape: bf16[64,128], index: 1, kind: input, shape index: {}]   ;;  %s649_s2 = inlined_call_operand.hbm [shape: bf16[128,128], index: 2, kind: input, shape index: {}]   ;;  %s650_s3 = inlined_call_operand.hbm [shape: bf16[128,128], index: 3, kind: input, shape index: {}]   ;;  %s651_s4 = inlined_call_operand.hbm [shape: f32[8,128], index: 4, kind: input, shape index: {}]   ;;  %s652_s5 = inlined_call_operand.hbm [shape: bf16[8,128], index: 5, kind: output, shape index: {}]  }
   0x1   :  { %11 = vsyncpa [#allocation6], 0 }
   0x2   :  { %12 = vsyncpa [#allocation9], 0  ;;  %s29_s20 = sshll.u32 %s648_s1, 4  ;;  %s30_s20 = int_to_ptr.hbm [resolvable:$true] %s29_s20 }
   0x3   :  { %13 = vsyncpa [#allocation4], 0  ;;  %s591_s21 = smov [#allocation5]   ;;  %s55_s25 = sshll.u32 %s650_s3, 4  ;;  %s56_s25 = int_to_ptr.hbm [resolvable:$true] %s55_s25 }
   0x4   :  { %s31_s22 = sshll.u32 %s591_s21, 4  ;;  %s592_s26 = smov 64   ;;  %s32_s22 = int_to_ptr.vmem [resolvable:$true] %s31_s22 }
   0x5   :  { %s593_s27 = smov 4   ;;  %s594_s28 = smov [#allocation8]  }
   0x6   :  { %37 = dma.hbm_to_vmem [thread:$0]  %s30_s20, 512, %s32_s22, [#allocation6], %s592_s26, %s592_s26, %s593_s27  }
   0x7   :  { %s57_s29 = sshll.u32 %s594_s28, 4  ;;  %s19_s7 = sshll.u32 %s647_s0, 4  ;;  %s58_s29 = int_to_ptr.vmem [resolvable:$true] %s57_s29  ;;  %s20_s7 = int_to_ptr.hbm [resolvable:$true] %s19_s7 }
   0x8   :  { %63 = dma.hbm_to_vmem [thread:$0]  %s56_s25, 1024, %s58_s29, [#allocation9], %s592_s26, %s592_s26, %s593_s27  }
   0x9   :  { %s42_s9 = sshll.u32 %s649_s2, 4  ;;  %s595_s10 = smov [#allocation2]   ;;  %s43_s9 = int_to_ptr.hbm [resolvable:$true] %s42_s9 }
   0xa   :  { %s21_s11 = sshll.u32 %s595_s10, 4  ;;  %s596_s3 = smov [#allocation7]   ;;  %s22_s11 = int_to_ptr.vmem [resolvable:$true] %s21_s11 }
   0xb   :  { %24 = dma.hbm_to_vmem [thread:$0]  %s20_s7, 128, %s22_s11, [#allocation3]  }
   0xc   :  { %s44_s12 = sshll.u32 %s596_s3, 4  ;;  %s69_s15 = sshll.u32 %s651_s4, 4  ;;  %s45_s12 = int_to_ptr.vmem [resolvable:$true] %s44_s12  ;;  %s70_s15 = int_to_ptr.hbm [resolvable:$true] %s69_s15 }
   0xd   :  { %50 = dma.hbm_to_vmem [thread:$0]  %s43_s9, 1024, %s45_s12, [#allocation6], %s592_s26, %s592_s26, %s593_s27  }
   0xe   :  { %s597_s0 = smov [#allocation10]  }
   0xf   :  { %s71_s16 = sshll.u32 %s597_s0, 4  ;;  %s72_s16 = int_to_ptr.vmem [resolvable:$true] %s71_s16 }
  0x10   :  { %74 = dma.hbm_to_vmem [thread:$0]  %s70_s15, 128, %s72_s16, [#allocation9]  }
  0x11   :  { %583 = dma.done.wait [#allocation3], 128  }
  0x12   :  { %584 = vsyncadd [#allocation3], 4294967168 }
  0x13   :  { %585 = dma.done.wait [#allocation6], 1536  }
  0x14   :  { %586 = vsyncadd [#allocation6], 4294965760 }
  0x15   :  { %587 = dma.done.wait [#allocation9], 1152  }
  0x16   :  { %588 = vsyncadd [#allocation9], 4294966144  ;;  %v414_v0 = vld [vmem:[#allocation5 + $0x18] sm:$0xff]  ;;  %v413_v2 = vld [vmem:[#allocation5 + $0x10] sm:$0xff]  ;;  %vm132_vm0 = vcmask 523264   ;;  %s598_s2 = smov [#allocation11]  }
  0x17   :  { %v422_v1 = vld [vmem:[#allocation7 + $0x38] sm:$0xff]  ;;  %140 = vmatpush.bf16.msra.mxu0 %v414_v0  ;;  %v421_v3 = vld [vmem:[#allocation7 + $0x30] sm:$0xff]  ;;  %v412_v4 = vld [vmem:[#allocation5 + $0x8] sm:$0xff]  ;;  %s316_s4 = sshll.u32 %s598_s2, 4  ;;  %s318_s19 = sshll.u32 %s652_s5, 4  ;;  %s317_s4 = int_to_ptr.vmem [resolvable:$true] %s316_s4  ;;  %s319_s19 = int_to_ptr.hbm [resolvable:$true] %s318_s19 }
  0x18   :  { %216 = vmatpush.bf16.msra.mxu1 %v422_v1  ;;  %v420_v5 = vld [vmem:[#allocation7 + $0x28] sm:$0xff]  ;;  %v411_v6 = vld [vmem:[#allocation5] sm:$0xff]  ;;  %v97_v7 = vld [vmem:[#allocation2] sm:$0xff] }
  0x19   :  { %v419_v8 = vld [vmem:[#allocation7 + $0x20] sm:$0xff]  ;;  %v98_v9 = vpack.c.bf16 %v97_v7, %v97_v7  ;;  %v418_v10 = vld [vmem:[#allocation7 + $0x18] sm:$0xff]  ;;  %v417_v11 = vld [vmem:[#allocation7 + $0x10] sm:$0xff] }
  0x1a   :  { %v416_v12 = vld [vmem:[#allocation7 + $0x8] sm:$0xff]  ;;  %v415_v13 = vld [vmem:[#allocation7] sm:$0xff]  ;;  %v430_v14 = vld [vmem:[#allocation8 + $0x38] sm:$0xff] }
  0x1b   :  { %141 = vmatpush.bf16.msra.mxu0 %v413_v2  ;;  %296 = vmatpush.bf16.msra.mxu2 %v430_v14  ;;  %v429_v15 = vld [vmem:[#allocation8 + $0x30] sm:$0xff]  ;;  %v428_v16 = vld [vmem:[#allocation8 + $0x28] sm:$0xff]  ;;  %v427_v17 = vld [vmem:[#allocation8 + $0x20] sm:$0xff] }
  0x1c   :  { %217 = vmatpush.bf16.msra.mxu1 %v421_v3  ;;  %v426_v18 = vld [vmem:[#allocation8 + $0x18] sm:$0xff]  ;;  %v96_v19 = vld [vmem:[#allocation10] sm:$0xff]  ;;  %v425_v20 = vld [vmem:[#allocation8 + $0x10] sm:$0xff] }
  0x1d   :  { %v107_v21 = vperm.slane %v96_v19, 0  ;;  %v424_v27 = vld [vmem:[#allocation8 + $0x8] sm:$0xff]  ;;  %v423_v28 = vld [vmem:[#allocation8] sm:$0xff]  ;;  %v167_v29 = vperm.slane %v96_v19, 1  ;;  %v247_v35 = vperm.slane %v96_v19, 2 }
  0x1f   :  { %142 = vmatpush.bf16.msra.mxu0 %v412_v4  ;;  %297 = vmatpush.bf16.msra.mxu2 %v429_v15 }
  0x20   :  { %218 = vmatpush.bf16.msra.mxu1 %v420_v5 }
  0x23   :  { %143 = vmatpush.bf16.msra.mxu0 %v411_v6  ;;  %298 = vmatpush.bf16.msra.mxu2 %v428_v16 }
  0x24   :  { %219 = vmatpush.bf16.msra.mxu1 %v419_v8 }
  0x26   :  { %346 = vmatmul.msk.bf16.vlgmr.msra.gmra.mxu0 %vm132_vm0, %v98_v9 }
  0x27   :  { %299 = vmatpush.bf16.msra.mxu2 %v427_v17 }
  0x28   :  { %220 = vmatpush.bf16.msra.mxu1 %v418_v10 }
  0x2b   :  { %300 = vmatpush.bf16.msra.mxu2 %v426_v18 }
  0x2c   :  { %221 = vmatpush.bf16.msra.mxu1 %v417_v11 }
  0x2f   :  { %301 = vmatpush.bf16.msra.mxu2 %v425_v20 }
  0x30   :  { %222 = vmatpush.bf16.msra.mxu1 %v416_v12 }
  0x33   :  { %302 = vmatpush.bf16.msra.mxu2 %v424_v27 }
  0x34   :  { %223 = vmatpush.bf16.msra.mxu1 %v415_v13 }
  0x37   :  { %303 = vmatpush.bf16.msra.mxu2 %v423_v28 }
  0xa3   :  { %v145_v22 = vpop.f32.mrf.mxu0 }
  0xa4   :  { %v146_v23 = vadd.f32 %v145_v22, %v107_v21 }
  0xa6   :  { %v149_v24 = vmax.f32 %v146_v23, 0.0 }
  0xa8   :  { %v150_v25 = vpack.c.bf16 %v149_v24, %v149_v24 }
  0xaa   :  { %224 = vmatmul.bf16.vlgmr.msra.gmra.mxu1 %v150_v25 }
  0xab   :  { %v147_v26 = vpop.f32.mrf.mxu0 }
 0x127   :  { %v225_v30 = vpop.f32.mrf.mxu1 }
 0x128   :  { %v226_v31 = vadd.f32 %v225_v30, %v167_v29 }
 0x12a   :  { %v229_v32 = vmax.f32 %v226_v31, 0.0 }
 0x12c   :  { %v230_v33 = vpack.c.bf16 %v229_v32, %v229_v32 }
 0x12e   :  { %304 = vmatmul.bf16.vlgmr.msra.gmra.mxu2 %v230_v33 }
 0x12f   :  { %v227_v34 = vpop.f32.mrf.mxu1 }
 0x1b1   :  { %v305_v36 = vpop.f32.mrf.mxu2 }
 0x1b2   :  { %v306_v37 = vadd.f32 %v305_v36, %v247_v35 }
 0x1b4   :  { %v309_v38 = vpack.c.bf16 %v306_v37, %v306_v37 }
 0x1b6   :  { %310 = vst [vmem:[#allocation11] sm:$0xf] %v309_v38 }
 0x1b7   :  { %321 = dma.vmem_to_hbm [thread:$0]  %s317_s4, 64, %s319_s19, [#allocation4]  }
 0x1b9   :  { %v307_v39 = vpop.f32.mrf.mxu2 }
 0x1ba   :  { %589 = dma.done.wait [#allocation4], 64  }
 0x1bb   :  { %590 = vsyncadd [#allocation4], 4294967232 }
 0x1bc   :  { %326 = vsyncpa [#allocation3], 1 }
 0x1bd   :  { %327 = vsyncpa [#allocation6], 1 }
 0x1be   :  { %328 = vsyncpa [#allocation9], 1 }
 0x1bf   :  { %329 = vsyncpa [#allocation4], 1 }

</bundles_post_ra>
